<compile_context>
chip_gen: v7x
topology: tpu7x:2x2x1
jax: 0.10.0
libtpu: 0.0.40
codegen_flags: <defaults>
</compile_context>

<pallas_src>
import functools

import jax
import jax.numpy as jnp
from jax import lax
from jax.experimental import pallas as pl
from jax.experimental.pallas import tpu as pltpu


def _round_up(x, m):
    return (x + m - 1) // m * m


@functools.lru_cache(maxsize=None)
def _vmem_capacity_bytes():
    """Per-TensorCore VMEM capacity; conservative fallback if query fails."""
    try:
        cap = int(getattr(pltpu.get_tpu_info(), "vmem_capacity_bytes", 0))
        if cap > 0:
            return cap
    except Exception:
        pass
    return 64 * 1024 * 1024  # v7x per-TC size: safe on every generation


# ----------------------------------------------------------------------------
# Pallas kernels: fused (A @ B) + bias with f32 MXU accumulation
# ----------------------------------------------------------------------------
def _mm_bias_kernel_single_k(a_ref, b_ref, bias_ref, o_ref):
    # Whole contraction in one K step: no accumulator scratch, no pl.when
    # phases, result written straight to the (lane-dense) output tile.
    o_ref[...] = (jnp.dot(a_ref[...], b_ref[...],
                          preferred_element_type=jnp.float32)
                  + bias_ref[...]).astype(o_ref.dtype)


def _mm_bias_kernel_multi_k(a_ref, b_ref, bias_ref, o_ref, acc_ref):
    @pl.when(pl.program_id(2) == 0)
    def _zero():
        acc_ref[...] = jnp.zeros_like(acc_ref)

    acc_ref[...] += jnp.dot(a_ref[...], b_ref[...],
                            preferred_element_type=jnp.float32)

    @pl.when(pl.program_id(2) == pl.num_programs(2) - 1)
    def _finish():
        o_ref[...] = (acc_ref[...] + bias_ref[...]).astype(o_ref.dtype)


# ----------------------------------------------------------------------------
# Tile selection (perf-review ladder)
# ----------------------------------------------------------------------------
def _select_tiles(M, K, Np, out_itemsize, budget):
    """Pick (tm, tk, tn):
       - tm ~256-512 with >= 2 M blocks (DMA/compute overlap + v7x megacore),
       - tn = Np so the bf16 weight matrix stays VMEM-resident,
       - fallback: shrink tm first, then tk (256-aligned), tn last."""
    Mp = _round_up(M, 16)  # bf16 packs 16 sublanes per vreg

    def vmem_bytes(tm, tk, tn):
        return (2 * tm * tk * 2                    # A tile, bf16, 2 buffers
                + 2 * tk * tn * 2                  # B tile, bf16, 2 buffers
                + 2 * tm * tn * out_itemsize       # out tile, 2 buffers
                + (tm * tn * 4 if tk < K else 0)   # f32 acc (multi-K only)
                + 2 * tn * 4)                      # bias row

    if Mp >= 1024:
        tm = 512
    elif Mp >= 512:
        tm = 256
    elif Mp >= 256:
        tm = 128
    elif Mp > 16:
        tm = _round_up((Mp + 1) // 2, 16)          # exactly 2 M blocks
    else:
        tm = Mp                                    # tiny layer: one 16-row block
    tk, tn = K, Np

    # 1) shrink tm (cheap: only adds grid steps, weights stay resident).
    while vmem_bytes(tm, tk, tn) > budget and tm > 128:
        tm = max(128, _round_up(tm // 2, 16))
    # 2) shrink tk to a 256-aligned chunk (K zero-padded; keeps the 256-wide
    #    MXU on v6e/v7x full).
    if vmem_bytes(tm, tk, tn) > budget:
        for cand in (2048, 1024, 512, 256):
            if cand < K:
                tk = cand
                if vmem_bytes(tm, tk, tn) <= budget:
                    break
    # 3) last resort: shrink tn (breaks B residency; keep 256-aligned when
    #    embed_dim allows so the MXU output width stays full).
    if vmem_bytes(tm, tk, tn) > budget:
        tn = 256 if Np % 256 == 0 else 128
    return tm, tk, tn, vmem_bytes(tm, tk, tn)


# ----------------------------------------------------------------------------
# Fused projection: out = a @ b + bias
# ----------------------------------------------------------------------------
def matmul_bias(a, b, bias, *, out_dtype=jnp.bfloat16):
    """a: [M, K] (any float), b: [K, Np] bf16 pre-packed (Np % 128 == 0),
    bias: [1, Np] f32.  Returns [M, Np] in out_dtype."""
    M, K = a.shape
    Kb, Np = b.shape
    assert K == Kb and Np % 128 == 0 and bias.shape == (1, Np)

    a = a.astype(jnp.bfloat16)
    b = b.astype(jnp.bfloat16)
    bias = bias.astype(jnp.float32)

    vmem_cap = _vmem_capacity_bytes()
    budget = int(vmem_cap * 0.55)                      # ~70 MiB v5e/v6e, ~35 MiB v7x
    limit_cap = min(int(vmem_cap * 0.75), 96 * 1024 * 1024)  # ~96 MiB v5e/v6e, 48 MiB v7x

    out_itemsize = jnp.dtype(out_dtype).itemsize
    tm, tk, tn, footprint = _select_tiles(M, K, Np, out_itemsize, budget)

    Mp = _round_up(M, tm)
    Kp = _round_up(K, tk)
    if (Mp, Kp) != (M, K):
        a = jnp.pad(a, ((0, Mp - M), (0, Kp - K)))     # zero rows/cols: benign
    if Kp != K:
        b = jnp.pad(b, ((0, Kp - K), (0, 0)))

    grid = (Mp // tm, Np // tn, Kp // tk)
    single_k = grid[2] == 1
    kernel = _mm_bias_kernel_single_k if single_k else _mm_bias_kernel_multi_k
    scratch = [] if single_k else [pltpu.VMEM((tm, tn), jnp.float32)]

    # Keep the limit above the actual footprint (budget may have been raised),
    # but never near the physical per-TC capacity.
    vmem_limit = int(min(max(32 * 1024 * 1024, int(footprint * 1.3)), limit_cap))
    vmem_limit = int(max(vmem_limit,
                         min(footprint + (4 << 20), int(vmem_cap * 0.9))))

    out = pl.pallas_call(
        kernel,
        out_shape=jax.ShapeDtypeStruct((Mp, Np), out_dtype),
        grid_spec=pltpu.PrefetchScalarGridSpec(
            num_scalar_prefetch=0,
            grid=grid,
            in_specs=[
                # TODO(synk): add pipeline_mode=pl.Buffered(3) on the A spec if
                # a profile shows exposed A-stream DMA (B/bias are resident).
                pl.BlockSpec((tm, tk), lambda i, j, k: (i, k)),
                pl.BlockSpec((tk, tn), lambda i, j, k: (k, j)),
                pl.BlockSpec((1, tn), lambda i, j, k: (0, j)),
            ],
            out_specs=pl.BlockSpec((tm, tn), lambda i, j, k: (i, j)),
            scratch_shapes=scratch,
        ),
        compiler_params=pltpu.CompilerParams(
            dimension_semantics=("parallel", "parallel", "arbitrary"),
            vmem_limit_bytes=vmem_limit),
    )(a, b, bias)
    return out[:M]


# ----------------------------------------------------------------------------
# PatchEmbed: params + forward
# ----------------------------------------------------------------------------
def init_patch_embed(key, *, img_size, patch_size, in_c, embed_dim):
    """Conv2d(in_c, embed_dim, k=patch, s=patch) params, pre-packed for Pallas.

    Weight reshape / transpose / lane-pad / bf16 cast done ONCE here (hoisted
    out of the jitted forward)."""
    del img_size  # only needed for shape checks in forward
    kw, kb = jax.random.split(key)
    K = in_c * patch_size * patch_size
    w = jax.random.normal(kw, (embed_dim, in_c, patch_size, patch_size),
                          jnp.float32) * jnp.sqrt(2.0 / K)
    b = 0.1 * jax.random.normal(kb, (embed_dim,), jnp.float32)

    Np = _round_up(embed_dim, 128)
    wmat = w.reshape(embed_dim, K).T                 # [K, E], (c, ph, pw) order
    wmat_p = jnp.zeros((K, Np), jnp.bfloat16).at[:, :embed_dim].set(
        wmat.astype(jnp.bfloat16))
    bias_p = jnp.zeros((1, Np), jnp.float32).at[:, :embed_dim].set(
        b.reshape(1, embed_dim))
    return {"w": w, "b": b, "wmat": wmat_p, "bias": bias_p}


@functools.partial(jax.jit,
                   static_argnames=("patch_size", "embed_dim", "out_dtype"))
def patch_embed_forward(x, wmat, bias, *, patch_size, embed_dim,
                        out_dtype=jnp.bfloat16):
    """x: [B, C, H, W] -> [B, num_patches, embed_dim].

    Matches torch: proj(x).flatten(2).transpose(1, 2); norm_layer=None => Identity.
    """
    B, C, H, W = x.shape
    assert H % patch_size == 0 and W % patch_size == 0, (H, W, patch_size)
    P = patch_size
    gh, gw = H // P, W // P
    # Cast BEFORE the im2col transpose: that transpose is a full HBM
    # read+write pass over the activations, so doing it in bf16 halves bytes.
    x = x.astype(jnp.bfloat16)
    # Non-overlapping patch extraction == pure reshape/transpose (no im2col
    # duplication).  Row order (gh outer, gw inner) matches torch's flatten(2).
    patches = x.reshape(B, C, gh, P, gw, P).transpose(0, 2, 4, 1, 3, 5)
    a = patches.reshape(B * gh * gw, C * P * P)
    # TODO(synk): longer-term, fuse the patch gather into the kernel (grid over
    # (batch, patch-row) with an index_map on the image, or accept NHWC) to
    # remove this standalone transpose HBM pass entirely.
    y = matmul_bias(a, wmat, bias, out_dtype=out_dtype)   # [B*gh*gw, Np]
    y = y[:, :embed_dim]
    # TODO(synk): norm_layer defaults to None (nn.Identity) in the spec; a
    # configured LayerNorm epilogue could be fused into the kernel later.
    return y.reshape(B, gh * gw, embed_dim)


if __name__ == "__main__":
    key = jax.random.PRNGKey(0)
    kx, kp = jax.random.split(key)
    # Small shapes consistent with the module: 32x32 image, 8x8 patches,
    # 3 input channels, embed_dim=128 -> 16 patches of 128 dims per image.
    B, C, IMG, PATCH, EMBED = 2, 3, 32, 8, 128
    x = jax.random.normal(kx, (B, C, IMG, IMG), jnp.float32)
    params = init_patch_embed(kp, img_size=IMG, patch_size=PATCH,
                              in_c=C, embed_dim=EMBED)

    out = patch_embed_forward(x, params["wmat"], params["bias"],
                              patch_size=PATCH, embed_dim=EMBED)
    out = jax.block_until_ready(out)
    num_patches = (IMG // PATCH) * (IMG // PATCH)
    assert out.shape == (B, num_patches, EMBED), out.shape
    assert out.dtype == jnp.bfloat16, out.dtype
    out_f32 = out.astype(jnp.float32)
    assert bool(jnp.all(jnp.isfinite(out_f32)))

    # Reference: plain XLA conv (f32) + flatten(2).transpose(1, 2).
    ref = lax.conv_general_dilated(
        x, params["w"], window_strides=(PATCH, PATCH), padding="VALID",
        dimension_numbers=("NCHW", "OIHW", "NCHW"))
    ref = ref + params["b"].reshape(1, EMBED, 1, 1)
    ref = ref.reshape(B, EMBED, num_patches).transpose(0, 2, 1)
    # Loose tolerance: bf16 operands + bf16 output, f32 MXU accumulation.
    assert bool(jnp.allclose(out_f32, ref, rtol=5e-2, atol=1e-1)), (
        float(jnp.max(jnp.abs(out_f32 - ref))))

    print("KERNEL_OK")
</pallas_src>

<mosaic_0001>
module attributes {stable_mosaic.version = 11 : i64} {
  func.func @_mm_bias_kernel_single_k(%arg0: i32, %arg1: i32, %arg2: i32, %arg3: memref<16x192xbf16, #tpu.memory_space<vmem>>, %arg4: memref<192x128xbf16, #tpu.memory_space<vmem>>, %arg5: memref<1x128xf32, #tpu.memory_space<vmem>>, %arg6: memref<16x128xbf16, #tpu.memory_space<vmem>>) attributes {dimension_semantics = [#tpu.dimension_semantics<parallel>, #tpu.dimension_semantics<parallel>, #tpu.dimension_semantics<arbitrary>], iteration_bounds = array<i64: 2, 1, 1>, scalar_prefetch = 0 : i64, scratch_operands = 0 : i64, tpu.core_type = #tpu.core_type<tc>, window_params = [{transform_indices = @transform_0, window_bounds = array<i64: 16, 192>}, {transform_indices = @transform_1, window_bounds = array<i64: 192, 128>}, {transform_indices = @transform_2, window_bounds = array<i64: 1, 128>}, {transform_indices = @transform_3, window_bounds = array<i64: 16, 128>}]} {
    %c0 = arith.constant 0 : index
    %c0_0 = arith.constant 0 : index
    %0 = vector.load %arg3[%c0, %c0_0] : memref<16x192xbf16, #tpu.memory_space<vmem>>, vector<16x192xbf16>
    %c0_1 = arith.constant 0 : index
    %c0_2 = arith.constant 0 : index
    %1 = vector.load %arg4[%c0_1, %c0_2] : memref<192x128xbf16, #tpu.memory_space<vmem>>, vector<192x128xbf16>
    %cst = arith.constant dense<0.000000e+00> : vector<16x128xf32>
    %2 = tpu.matmul %0, %1, %cst {dimension_numbers = #tpu.dot_dimension_numbers<[1], [0], [0], [1], [0, 0, 1, 1], [], []>} : vector<16x192xbf16>, vector<192x128xbf16>, vector<16x128xf32> -> vector<16x128xf32>
    %c0_3 = arith.constant 0 : index
    %c0_4 = arith.constant 0 : index
    %3 = vector.load %arg5[%c0_3, %c0_4] : memref<1x128xf32, #tpu.memory_space<vmem>>, vector<1x128xf32>
    %4 = vector.broadcast %3 : vector<1x128xf32> to vector<16x128xf32>
    %5 = arith.addf %2, %4 : vector<16x128xf32>
    %6 = arith.truncf %5 : vector<16x128xf32> to vector<16x128xbf16>
    %c0_5 = arith.constant 0 : index
    %c0_6 = arith.constant 0 : index
    %7 = vector.load %arg6[%c0_5, %c0_6] : memref<16x128xbf16, #tpu.memory_space<vmem>>, vector<16x128xbf16>
    tpu.vector_store %arg6[%c0_5, %c0_6], %6 {strides = array<i32>} : memref<16x128xbf16, #tpu.memory_space<vmem>>, vector<16x128xbf16>,
    return
  }
  func.func @transform_0(%arg0: i32, %arg1: i32, %arg2: i32) -> (i32, i32) {
    %c0_i32 = arith.constant 0 : i32
    return %arg0, %arg2 : i32, i32
  }
  func.func @transform_1(%arg0: i32, %arg1: i32, %arg2: i32) -> (i32, i32) {
    %c0_i32 = arith.constant 0 : i32
    return %arg2, %arg1 : i32, i32
  }
  func.func @transform_2(%arg0: i32, %arg1: i32, %arg2: i32) -> (i32, i32) {
    %c0_i32 = arith.constant 0 : i32
    %c0_i32_0 = arith.constant 0 : i32
    return %c0_i32, %arg1 : i32, i32
  }
  func.func @transform_3(%arg0: i32, %arg1: i32, %arg2: i32) -> (i32, i32) {
    %c0_i32 = arith.constant 0 : i32
    return %arg0, %arg1 : i32, i32
  }
}

</mosaic_0001>

<bundles_post_ra>
// kernel: patch_embed_forward.1
= control target key start
LH: loop header
LB: loop body
LE: loop exit
PB: predicated region body
PF: predicated region fallthrough
CT: control target
= control target key end

     0   :  { %8 = vsyncpa [#allocation3], 0  ;;  %s928_s0 = inlined_call_operand.vmem [shape: bf16[32,192], index: 0, kind: input, shape index: {}]   ;;  %s929_s1 = inlined_call_operand.vmem [shape: bf16[192,128], index: 1, kind: input, shape index: {}]   ;;  %s930_s2 = inlined_call_operand.vmem [shape: f32[1,128], index: 2, kind: input, shape index: {}]   ;;  %s931_s3 = inlined_call_operand.hbm [shape: bf16[32,128], index: 3, kind: output, shape index: {}]  }
   0x1   :  { %10 = vsyncpa [#allocation3 + $0x1], 0  ;;  %s775_s12 = smov 0   ;;  %s777_s13 = smov 0  }
   0x2   :  { %s779_s14 = smov 0   ;;  %s781_s15 = smov 0  }
   0x3   :  { %s783_s16 = smov 0   ;;  %s785_s17 = smov 0  }
   0x4 LB: > { %s555_s18 = sadd.s32 4294967295, %s749_s17   ;;  %s556_s19 = sadd.s32 4294967294, %s749_s17   ;;  %s749_s17 = sphi %s785_s17, %s16_s17   ;;  %s745_s16 = sphi %s783_s16, %s938_s16   ;;  %s741_s15 = sphi %s781_s15, %s937_s15   ;;  %s737_s14 = sphi %s779_s14, %s936_s14   ;;  %s733_s13 = sphi %s777_s13, %s935_s13   ;;  %s729_s12 = sphi %s775_s12, %s934_s12  }
   0x5   : > { %s35_s20 = sadd.s32 1, %s745_s16  ;;  %s126_s21 = sadd.s32 1, %s737_s14 }
   0x6   : > { %p37_p0 = scmp.ge.s32.totalorder %s35_s20, 2  ;;  %p136_p1 = scmp.ne.s32.totalorder %s737_s14, %s733_s13 }
   0x7   : > { %p137_p2 = scmp.eq.s32.totalorder %s555_s18, 1  ;;  %p142_p3 = scmp.ne.s32.totalorder %s733_s13, %s729_s12 }
   0x8   : > { %s940_s20 = smov (%p37_p0, %s35_s20), 0  ;;  %p143_p5 = scmp.eq.s32.totalorder %s556_s19, 1 }
   0x9   : > { %p815_p4 = por %p137_p2, %p136_p1  ;;  %s121_s23 = ssub.s32 %s745_s16, %s940_s20 }
   0xa   : > { %p561_p6 = scmp.ge.s32.totalorder %s749_s17, 1  ;;  %p124_p7 = scmp.eq.s32.totalorder %s121_s23, 0 }
   0xb   : > { %p822_p8 = por %p143_p5, %p142_p3  ;;  %p194_p9 = scmp.lt.s32.totalorder %s749_s17, 3 }
   0xc   : > { %s828_s25 = scalar_select %p124_p7, %s737_s14, %s126_s21  }
   0xd   : > { %p195_p10 = pnand %p561_p6, %p194_p9 }
   0xe   : > { %v656_v0 = vld [vmem:[%s929_s1] sm:$0xff] (!%p195_p10)   ;;  %v751_v1 = vmov (!%p195_p10), 0   ;;  %s563_s28 = sshll.u32 (!%p195_p10), %s741_s15, 1  ;;  %v657_v2 = vld [vmem:[%s929_s1 + $0x8] sm:$0xff] (!%p195_p10)   ;;  %v658_v3 = vld [vmem:[%s929_s1 + $0x10] sm:$0xff] (!%p195_p10)   ;;  %vm374_vm0 = vcmask (!%p195_p10), 523264  }
   0xf   : > { %198 = sbr.rel (%p195_p10) target bundleno = 296 (0x128), region = 32  ;;  %378 = vmatprep.subr.bf16.mxu0 (!%p195_p10), %v751_v1  ;;  %p236_p11 = scmp.lt.s32.totalorder (!%p195_p10), %s563_s28, 3  ;;  %v659_v4 = vld [vmem:[%s929_s1 + $0x18] sm:$0xff] (!%p195_p10)   ;;  %v660_v6 = vld [vmem:[%s929_s1 + $0x20] sm:$0xff] (!%p195_p10)   ;;  %v661_v7 = vld [vmem:[%s929_s1 + $0x28] sm:$0xff] (!%p195_p10)  }
  0x10   : > { %379 = vmatpush1.bf16.msra.mxu0 (!%p195_p10), %v656_v0  ;;  %v662_v8 = vld [vmem:[%s929_s1 + $0x30] sm:$0xff] (!%p195_p10)   ;;  %v663_v9 = vld [vmem:[%s929_s1 + $0x38] sm:$0xff] (!%p195_p10)   ;;  %v664_v10 = vld [vmem:[%s929_s1 + $0x40] sm:$0xff] (!%p195_p10)   ;;  %s231_s18 = sand.u32 (!%p195_p10), 1, %s733_s13  }
  0x11   : > { %380 = vmatprep.subr.bf16.mxu0 (!%p195_p10), %v751_v1  ;;  %v665_v11 = vld [vmem:[%s929_s1 + $0x48] sm:$0xff] (!%p195_p10)   ;;  %v666_v12 = vld [vmem:[%s929_s1 + $0x50] sm:$0xff] (!%p195_p10)   ;;  %v667_v13 = vld [vmem:[%s929_s1 + $0x58] sm:$0xff] (!%p195_p10)   ;;  %s562_s19 = sshll.u32 (!%p195_p10), %s231_s18, 3  ;;  %s882_s4 = scalar_lea.sflag (!%p195_p10), [#allocation3], %s231_s18 }
  0x12   : > { %v566_v15 = vld [vmem:[%s930_s2] ss:$0 sm:$0xff] (!%p195_p10)  ;;  %s233_s26 = scalar_lea.vmem (!%p195_p10), [#allocation2], %s562_s19 }
  0x13   : > { %s444_s27 = sshll.u32 (!%p195_p10), %s233_s26, 4  ;;  %s875_s27 = int_to_ptr.vmem [resolvable:$true] %s444_s27 }
  0x14   : > { %381 = vmatpush1.bf16.msra.mxu0 (!%p195_p10), %v657_v2  ;;  %s671_s5 = scalar_lea.vmem (!%p195_p10), %s875_s27, 128 }
  0x15   : > { %382 = vmatprep.subr.bf16.mxu0 (!%p195_p10), %v751_v1  ;;  %p672_p12 = scmp.ne.s32.totalorder (!%p195_p10), %s875_s27, %s671_s5 }
  0x16   : > { %s942_s28 = smov (!%p236_p11, %s563_s28), 3 }
  0x17   : > { %s589_s6 = sshll.u32 %s942_s28, 3  ;;  %s592_s28 = sshll.u32 %s741_s15, 7 }
  0x18   : > { %383 = vmatpush1.bf16.msra.mxu0 %v658_v3  ;;  %s243_s11 = scalar_lea.vmem %s928_s0, %s589_s6  ;;  %s880_s30 = scalar_lea.hbm %s931_s3, %s592_s28 }
  0x19   : > { %384 = vmatprep.subr.bf16.mxu0 %v751_v1  ;;  %v670_v5 = vld [vmem:[%s243_s11 + $0x4] ss:$8 sps:$4 sm:$0xff]   ;;  %v668_v14 = vld [vmem:[%s243_s11] ss:$8 sps:$4 sm:$0xff]   ;;  %p673_p13 = pnand %p672_p12, %p815_p4  ;;  %s752_s15 = smov [#allocation2]  }
  0x1a   : > { %581 = vmatprep.mubr.msk.bf16.mxu0 %vm374_vm0, %v670_v5  ;;  %s675_s6 = sshll.u32 %s752_s15, 4  ;;  %s676_s6 = int_to_ptr.vmem [resolvable:$false] %s675_s6 }
  0x1b   : > { %p674_p0 = pneg %p673_p13  ;;  %s677_s7 = scalar_lea.vmem %s676_s6, 256 }
  0x1c   : > { %385 = vmatpush1.bf16.msra.mxu0 %v659_v4  ;;  %p678_p1 = scmp.lt.s32.totalorder %s875_s27, %s676_s6  ;;  %p679_p2 = scmp.lt.s32.totalorder %s677_s7, %s671_s5 }
  0x1d   : > { %386 = vmatprep.subr.bf16.mxu0 %v751_v1 }
  0x1e   : > { %p680_p3 = por %p679_p2, %p678_p1 }
  0x20   : > { %387 = vmatpush1.bf16.msra.mxu0 %v660_v6  ;;  %p681_p5 = pnand %p680_p3, %p674_p0 }
  0x21   : > { %388 = vmatprep.subr.bf16.mxu0 %v751_v1 }
  0x24   : > { %389 = vmatpush1.bf16.msra.mxu0 %v661_v7 }
  0x25   : > { %390 = vmatprep.subr.bf16.mxu0 %v751_v1 }
  0x28   : > { %391 = vmatpush1.bf16.msra.mxu0 %v662_v8 }
  0x29   : > { %392 = vmatprep.subr.bf16.mxu0 %v751_v1 }
  0x2c   : > { %393 = vmatpush1.bf16.msra.mxu0 %v663_v9 }
  0x2d   : > { %394 = vmatprep.subr.bf16.mxu0 %v751_v1 }
  0x30   : > { %395 = vmatpush1.bf16.msra.mxu0 %v664_v10 }
  0x31   : > { %396 = vmatprep.subr.bf16.mxu0 %v751_v1 }
  0x34   : > { %397 = vmatpush1.bf16.msra.mxu0 %v665_v11 }
  0x35   : > { %398 = vmatprep.subr.bf16.mxu0 %v751_v1 }
  0x38   : > { %399 = vmatpush1.bf16.msra.mxu0 %v666_v12 }
  0x39   : > { %400 = vmatprep.subr.bf16.mxu0 %v751_v1 }
  0x3c   : > { %401 = vmatpush1.bf16.msra.mxu0 %v667_v13 }
  0x3f   : > { %411 = vmatmul.mubr.bf16.vlgmr.msra.gmra.mrb[0].mxu0 %v668_v14 }
 0x112   : > { %v412_v16 = vpop.f32.mrb[0].mxu0 }
 0x113   : > { %v414_v17 = vpop.f32.mrb[1].mxu0  ;;  %v413_v19 = vadd.f32 %v566_v15, %v412_v16 }
 0x114   : > { %v415_v18 = vpop.f32.mrb[2].mxu0 }
 0x115   : > { %v416_v20 = vadd.f32 %v566_v15, %v415_v18  ;;  %v417_v21 = vpop.f32.mrb[3].mxu0 }
 0x117   : > { %v596_v22 = vpack.c.bf16 %v416_v20, %v413_v19 }
 0x119   : > { %597 = vst [vmem:[%s233_s26] sm:$0xff] %v596_v22  }
 0x11a   : > { %684 = shalt.err (!%p681_p5)
}
 0x11b   : > { %s685_s8 = scalar_lea.hbm %s880_s30, 128  ;;  %s689_s18 = scalar_lea.hbm %s931_s3, 256 }
 0x11c   : > { %p686_p6 = scmp.ne.s32.totalorder %s880_s30, %s685_s8  ;;  %p690_p10 = scmp.lt.u32.totalorder %s880_s30, %s931_s3 }
 0x11d   : > { %p691_p11 = scmp.lt.u32.totalorder %s689_s18, %s685_s8  ;;  %p693_p13 = scmp.lt.u32.totalorder %s685_s8, %s880_s30 }
 0x11e   : > { %p687_p7 = pnand %p686_p6, %p815_p4 }
 0x11f   : > { %p692_p12 = por %p691_p11, %p690_p10 }
 0x120   : > { %p688_p9 = pneg %p687_p7 }
 0x121   : > { %p694_p0 = por %p693_p13, %p692_p12 }
 0x123   : > { %p695_p1 = pnand %p694_p0, %p688_p9 }
 0x125   : > { %698 = shalt.err (!%p695_p1)
}
 0x126   : > { %s753_s23 = smov 64   ;;  %s754_s26 = smov 4  }
 0x127   : > { %598 = dma.vmem_to_hbm [thread:$0]  (%p815_p4), %s875_s27, 128, %s880_s30, %s882_s4, %s753_s23, %s753_s23, %s754_s26  }
 0x128 PF: > { %p604_p2 = scmp.ge.s32.totalorder %s749_s17, 2  ;;  %s459_s28 = sand.u32 1, %s729_s12  }
 0x129   : > { %s460_s11 = scalar_lea.sflag [#allocation3], %s459_s28 }
 0x12a   : > { %p601_p3 = pnand %p604_p2, %p822_p8 }
 0x12c   : > { %724 = dma.done.wait (!%p601_p3), %s460_s11, 128  }
 0x12d   : > { %726 = vsyncadd (!%p601_p3), %s460_s11, 4294967168  ;;  %s16_s17 = sadd.s32 1, %s749_s17   ;;  %s934_s12 = smov %s733_s13 }
 0x12e   : > { %p13_p5 = scmp.ge.s32.totalorder %s16_s17, 4   ;;  %s935_s13 = smov %s737_s14 }
 0x12f   : > { %s936_s14 = smov %s828_s25  ;;  %s937_s15 = smov %s745_s16 }
 0x130   : > { %s938_s16 = smov %s940_s20  ;;  %15 = sbr.rel (!%p13_p5) target bundleno = 4 (0x4), region = 73 }
 0x137   :  { %465 = vsyncpa [#allocation3], 1 }
 0x138   :  { %467 = vsyncpa [#allocation3 + $0x1], 1 }

</bundles_post_ra>
